<compile_context>
chip_gen: v7x
topology: tpu7x:2x2x1
jax: 0.10.0
libtpu: 0.0.40
codegen_flags: <defaults>
</compile_context>

<pallas_src>
import jax
import jax.numpy as jnp
from jax.experimental import pallas as pl
from jax.experimental.pallas import tpu as pltpu


def basic_block_forward(x_nchw, params):
    """BasicBlock forward. NCHW in / NCHW out. stride=1, downsample=None."""
    N, Cin, H, W = x_nchw.shape
    w1p, b1 = params["w1p"], params["b1"]
    w2p, b2 = params["w2p"], params["b2"]
    C, KP = w1p.shape
    assert Cin == C, "downsample=None requires inplanes == planes"
    assert Cin % 8 == 0, "channel count must be sublane-aligned (multiple of 8)"
    HW = H * W
    K1 = 9 * Cin
    PAD = 128                      # lane-aligned halo for the flat buffer, >= W + 1
    assert PAD >= W + 1
    dt = x_nchw.dtype

    # Free reshape (contiguous): lane axis = flattened H*W, sublane axis = channels.
    x_flat = x_nchw.reshape(N, Cin, HW)

    def im2col(src, ext, p_scr, wmask_l, wmask_r):
        """Scatter the nine 3x3-'same' taps of src (Csrc, HW) into p_scr rows.

        ext is (Csrc, PAD + HW + PAD) scratch whose pads are already zero, so
        vertically out-of-range taps read zeros; the horizontal row-wrap of the
        flat layout is masked.  Row t*Csrc + c of p_scr holds channel c shifted
        by tap t = kh*3 + kw (matching the fused weight layout in the wrapper).
        """
        Csrc = src.shape[0]
        ext[:, PAD:PAD + HW] = src.astype(ext.dtype)
        for kh in range(3):
            for kw in range(3):
                t = kh * 3 + kw
                dh, dw = kh - 1, kw - 1
                if dh == 0 and dw == 0:
                    # Centre tap: straight from the in-register activation.
                    p_scr[t * Csrc:(t + 1) * Csrc, :] = src.astype(p_scr.dtype)
                    continue
                off = PAD + dh * W + dw
                tap = ext[:, off:off + HW]          # lane-shifted (Csrc, HW) read
                if dw == -1:
                    tap = jnp.where(wmask_l, tap, 0.0)
                elif dw == 1:
                    tap = jnp.where(wmask_r, tap, 0.0)
                p_scr[t * Csrc:(t + 1) * Csrc, :] = tap.astype(p_scr.dtype)

    def kernel(x_ref, w1_ref, b1_ref, w2_ref, b2_ref, o_ref, p_scr, ext):
        # Zero only the halo pads and the K-padding rows (a few vregs).  Done
        # every step (not under program_id == 0) so it stays correct when the
        # batch grid axis is sharded across TensorCores (v7x) and each core
        # gets its own scratch.
        ext[:, 0:PAD] = jnp.zeros((Cin, PAD), ext.dtype)
        ext[:, PAD + HW:2 * PAD + HW] = jnp.zeros((Cin, PAD), ext.dtype)
        if KP > K1:
            p_scr[K1:KP, :] = jnp.zeros((KP - K1, HW), p_scr.dtype)

        # w-coordinate masks for the row-wrap of the flat layout; built once per
        # step, shared by both convs (1 viota + 2 compares).
        ww = jax.lax.broadcasted_iota(jnp.int32, (1, HW), 1) % W
        wmask_l = ww >= 1          # left neighbour exists  (dw == -1)
        wmask_r = ww <= W - 2      # right neighbour exists (dw == +1)

        x = x_ref[0]                                           # (Cin, HW)

        # conv1 (BN1 scale pre-folded into w1) -> one MXU matmul; + shift, ReLU.
        im2col(x, ext, p_scr, wmask_l, wmask_r)
        out1 = jnp.dot(w1_ref[...], p_scr[...],
                       preferred_element_type=jnp.float32) + b1_ref[...]
        out1 = jnp.maximum(out1, 0.0)

        # conv2 (BN2 scale pre-folded into w2); + shift, residual add, ReLU.
        im2col(out1, ext, p_scr, wmask_l, wmask_r)
        out2 = jnp.dot(w2_ref[...], p_scr[...],
                       preferred_element_type=jnp.float32) + b2_ref[...]
        out2 = out2 + x.astype(jnp.float32)
        o_ref[...] = jnp.maximum(out2, 0.0)[None].astype(o_ref.dtype)

    # NOTE: at real ResNet sizes add a row-block grid axis (2-row input halo) for
    # deeper pipelining and bounded VMEM; at these shapes one image per step fits
    # comfortably and keeps the batch axis sharded across cores on v7x.
    out_flat = pl.pallas_call(
        kernel,
        out_shape=jax.ShapeDtypeStruct((N, C, HW), dt),
        grid_spec=pltpu.PrefetchScalarGridSpec(
            num_scalar_prefetch=0,
            grid=(N,),
            in_specs=[
                pl.BlockSpec((1, Cin, HW), lambda n: (n, 0, 0)),   # x (also residual)
                pl.BlockSpec((C, KP), lambda n: (0, 0)),           # w1 * s1, K-padded
                pl.BlockSpec((C, 1), lambda n: (0, 0)),            # bn1 shift
                pl.BlockSpec((C, KP), lambda n: (0, 0)),           # w2 * s2, K-padded
                pl.BlockSpec((C, 1), lambda n: (0, 0)),            # bn2 shift
            ],
            out_specs=pl.BlockSpec((1, C, HW), lambda n: (n, 0, 0)),
            scratch_shapes=[
                pltpu.VMEM((KP, HW), dt),               # im2col patch matrix
                pltpu.VMEM((Cin, 2 * PAD + HW), dt),    # zero-haloed flat activation
            ],
        ),
        compiler_params=pltpu.CompilerParams(
            dimension_semantics=("parallel",)),
    )(x_flat, w1p, b1, w2p, b2)

    return out_flat.reshape(N, C, H, W)


# ----------------------------- parameter setup ------------------------------

def make_params(key, inplanes, planes):
    assert inplanes == planes, "BasicBlock with downsample=None"
    ks = jax.random.split(key, 10)
    eps = 1e-5
    # PyTorch-style OIHW conv weights.
    w1_oihw = jax.random.normal(ks[0], (planes, inplanes, 3, 3), jnp.float32) * 0.1
    w2_oihw = jax.random.normal(ks[1], (planes, planes, 3, 3), jnp.float32) * 0.1
    # Non-trivial deterministic BN params / running stats (eval mode).
    g1 = 1.0 + 0.3 * jax.random.normal(ks[2], (planes,), jnp.float32)
    be1 = 0.1 * jax.random.normal(ks[3], (planes,), jnp.float32)
    m1 = 0.1 * jax.random.normal(ks[4], (planes,), jnp.float32)
    v1 = 0.5 + jax.random.uniform(ks[5], (planes,), jnp.float32)
    g2 = 1.0 + 0.3 * jax.random.normal(ks[6], (planes,), jnp.float32)
    be2 = 0.1 * jax.random.normal(ks[7], (planes,), jnp.float32)
    m2 = 0.1 * jax.random.normal(ks[8], (planes,), jnp.float32)
    v2 = 0.5 + jax.random.uniform(ks[9], (planes,), jnp.float32)

    s1 = g1 / jnp.sqrt(v1 + eps)
    sh1 = be1 - m1 * s1
    s2 = g2 / jnp.sqrt(v2 + eps)
    sh2 = be2 - m2 * s2

    K1 = 9 * inplanes
    KP = max(128, ((K1 + 127) // 128) * 128)   # pad contraction depth for the MXU

    def fuse(w_oihw, scale):
        o, i = w_oihw.shape[0], w_oihw.shape[1]
        # [cout, (kh*3+kw)*Cin + cin], matching the im2col patch-row layout.
        w_mat = jnp.transpose(w_oihw, (0, 2, 3, 1)).reshape(o, 9 * i)
        w_mat = w_mat * scale[:, None]          # BN scale folded into the weights
        return jnp.pad(w_mat, ((0, 0), (0, KP - 9 * i)))

    return {
        "w1p": fuse(w1_oihw, s1), "b1": sh1[:, None],
        "w2p": fuse(w2_oihw, s2), "b2": sh2[:, None],
        "w1_oihw": w1_oihw, "w2_oihw": w2_oihw,
        "s1": s1, "sh1": sh1, "s2": s2, "sh2": sh2,
    }


def reference_forward(x_nchw, params):
    """Pure-JAX reference of the same forward (eval-mode BN folded)."""
    def conv(x, w_oihw):
        return jax.lax.conv_general_dilated(
            x, w_oihw, window_strides=(1, 1), padding=((1, 1), (1, 1)),
            dimension_numbers=("NCHW", "OIHW", "NCHW"),
            precision=jax.lax.Precision.HIGHEST)

    s1 = params["s1"].reshape(1, -1, 1, 1)
    b1 = params["sh1"].reshape(1, -1, 1, 1)
    s2 = params["s2"].reshape(1, -1, 1, 1)
    b2 = params["sh2"].reshape(1, -1, 1, 1)
    out = jnp.maximum(conv(x_nchw, params["w1_oihw"]) * s1 + b1, 0.0)
    out = conv(out, params["w2_oihw"]) * s2 + b2 + x_nchw
    return jnp.maximum(out, 0.0)


if __name__ == "__main__":
    key = jax.random.PRNGKey(0)
    kx, kp = jax.random.split(key)

    N, C, H, W = 2, 8, 16, 16          # inplanes == planes, stride=1, downsample=None
    x = jax.random.normal(kx, (N, C, H, W), jnp.float32)
    params = make_params(kp, inplanes=C, planes=C)

    out = jax.block_until_ready(basic_block_forward(x, params))
    ref = reference_forward(x, params)

    assert out.shape == (N, C, H, W)
    err = jnp.max(jnp.abs(out - ref))
    assert jnp.allclose(out, ref, atol=2e-4, rtol=2e-4), f"max abs err {err}"

    print("KERNEL_OK")
</pallas_src>

<mosaic_0001>
module attributes {stable_mosaic.version = 11 : i64} {
  func.func @kernel(%arg0: i32, %arg1: memref<1x8x256xf32, #tpu.memory_space<vmem>>, %arg2: memref<8x128xf32, #tpu.memory_space<vmem>>, %arg3: memref<8x1xf32, #tpu.memory_space<vmem>>, %arg4: memref<8x128xf32, #tpu.memory_space<vmem>>, %arg5: memref<8x1xf32, #tpu.memory_space<vmem>>, %arg6: memref<1x8x256xf32, #tpu.memory_space<vmem>>, %arg7: memref<128x256xf32, #tpu.memory_space<vmem>>, %arg8: memref<8x512xf32, #tpu.memory_space<vmem>>) attributes {dimension_semantics = [#tpu.dimension_semantics<parallel>], iteration_bounds = array<i64: 2>, scalar_prefetch = 0 : i64, scratch_operands = 2 : i64, tpu.core_type = #tpu.core_type<tc>, window_params = [{transform_indices = @transform_0, window_bounds = array<i64: 1, 8, 256>}, {pipeline_mode = #tpu.pipeline_mode<synchronous>, transform_indices = @transform_1, window_bounds = array<i64: 8, 128>}, {pipeline_mode = #tpu.pipeline_mode<synchronous>, transform_indices = @transform_2, window_bounds = array<i64: 8, 1>}, {pipeline_mode = #tpu.pipeline_mode<synchronous>, transform_indices = @transform_3, window_bounds = array<i64: 8, 128>}, {pipeline_mode = #tpu.pipeline_mode<synchronous>, transform_indices = @transform_4, window_bounds = array<i64: 8, 1>}, {transform_indices = @transform_5, window_bounds = array<i64: 1, 8, 256>}]} {
    %cst = arith.constant 0.000000e+00 : f32
    %0 = vector.broadcast %cst : f32 to vector<8x128xf32>
    %c0 = arith.constant 0 : index
    %c0_0 = arith.constant 0 : index
    %1 = vector.load %arg8[%c0, %c0_0] : memref<8x512xf32, #tpu.memory_space<vmem>>, vector<8x128xf32>
    tpu.vector_store %arg8[%c0, %c0_0], %0 {strides = array<i32>} : memref<8x512xf32, #tpu.memory_space<vmem>>, vector<8x128xf32>,
    %cst_1 = arith.constant 0.000000e+00 : f32
    %2 = vector.broadcast %cst_1 : f32 to vector<8x128xf32>
    %c0_2 = arith.constant 0 : index
    %c384 = arith.constant 384 : index
    %3 = vector.load %arg8[%c0_2, %c384] : memref<8x512xf32, #tpu.memory_space<vmem>>, vector<8x128xf32>
    tpu.vector_store %arg8[%c0_2, %c384], %2 {strides = array<i32>} : memref<8x512xf32, #tpu.memory_space<vmem>>, vector<8x128xf32>,
    %cst_3 = arith.constant 0.000000e+00 : f32
    %4 = vector.broadcast %cst_3 : f32 to vector<56x256xf32>
    %c72 = arith.constant 72 : index
    %c0_4 = arith.constant 0 : index
    %5 = vector.load %arg7[%c72, %c0_4] : memref<128x256xf32, #tpu.memory_space<vmem>>, vector<56x256xf32>
    tpu.vector_store %arg7[%c72, %c0_4], %4 {strides = array<i32>} : memref<128x256xf32, #tpu.memory_space<vmem>>, vector<56x256xf32>,
    %6 = tpu.iota {dimensions = array<i32: 1>} : vector<1x256xi32>
    %c16_i32 = arith.constant 16 : i32
    %c0_i32 = arith.constant 0 : i32
    %7 = arith.cmpi eq, %c16_i32, %c0_i32 : i32
    %c1_i32 = arith.constant 1 : i32
    %8 = arith.select %7, %c1_i32, %c16_i32 : i32
    %9 = vector.broadcast %8 : i32 to vector<1x256xi32>
    %10 = arith.remsi %6, %9 : vector<1x256xi32>
    %c0_i32_5 = arith.constant 0 : i32
    %11 = vector.broadcast %c0_i32_5 : i32 to vector<1x256xi32>
    %12 = arith.cmpi ne, %10, %11 : vector<1x256xi32>
    %c0_i32_6 = arith.constant 0 : i32
    %13 = vector.broadcast %c0_i32_6 : i32 to vector<1x256xi32>
    %14 = arith.cmpi slt, %10, %13 : vector<1x256xi32>
    %c0_i32_7 = arith.constant 0 : i32
    %15 = arith.cmpi slt, %8, %c0_i32_7 : i32
    %16 = vector.broadcast %15 : i1 to vector<1x256xi1>
    %17 = vector.broadcast %16 : vector<1x256xi1> to vector<1x256xi1>
    %18 = arith.xori %14, %17 : vector<1x256xi1>
    %19 = arith.andi %18, %12 : vector<1x256xi1>
    %20 = vector.broadcast %8 : i32 to vector<1x256xi32>
    %21 = arith.addi %10, %20 : vector<1x256xi32>
    %22 = arith.select %19, %21, %10 : vector<1x256xi1>, vector<1x256xi32>
    %c1_i32_8 = arith.constant 1 : i32
    %23 = vector.broadcast %c1_i32_8 : i32 to vector<1x256xi32>
    %24 = arith.cmpi sge, %22, %23 : vector<1x256xi32>
    %c14_i32 = arith.constant 14 : i32
    %25 = vector.broadcast %c14_i32 : i32 to vector<1x256xi32>
    %26 = arith.cmpi sle, %22, %25 : vector<1x256xi32>
    %c0_9 = arith.constant 0 : index
    %c0_10 = arith.constant 0 : index
    %c0_11 = arith.constant 0 : index
    %27 = vector.load %arg1[%c0_9, %c0_10, %c0_11] : memref<1x8x256xf32, #tpu.memory_space<vmem>>, vector<1x8x256xf32>
    %28 = vector.shape_cast %27 : vector<1x8x256xf32> to vector<8x256xf32>
    %c0_12 = arith.constant 0 : index
    %c128 = arith.constant 128 : index
    %29 = vector.load %arg8[%c0_12, %c128] : memref<8x512xf32, #tpu.memory_space<vmem>>, vector<8x256xf32>
    tpu.vector_store %arg8[%c0_12, %c128], %28 {strides = array<i32>} : memref<8x512xf32, #tpu.memory_space<vmem>>, vector<8x256xf32>,
    %c0_13 = arith.constant 0 : index
    %c111 = arith.constant 111 : index
    %30 = vector.load %arg8[%c0_13, %c111] : memref<8x512xf32, #tpu.memory_space<vmem>>, vector<8x256xf32>
    %cst_14 = arith.constant 0.000000e+00 : f32
    %31 = vector.shape_cast %24 : vector<1x256xi1> to vector<1x256xi1>
    %32 = vector.broadcast %31 : vector<1x256xi1> to vector<8x256xi1>
    %33 = vector.broadcast %cst_14 : f32 to vector<8x256xf32>
    %34 = arith.select %32, %30, %33 : vector<8x256xi1>, vector<8x256xf32>
    %c0_15 = arith.constant 0 : index
    %c0_16 = arith.constant 0 : index
    %35 = vector.load %arg7[%c0_15, %c0_16] : memref<128x256xf32, #tpu.memory_space<vmem>>, vector<8x256xf32>
    tpu.vector_store %arg7[%c0_15, %c0_16], %34 {strides = array<i32>} : memref<128x256xf32, #tpu.memory_space<vmem>>, vector<8x256xf32>,
    %c0_17 = arith.constant 0 : index
    %c112 = arith.constant 112 : index
    %36 = vector.load %arg8[%c0_17, %c112] : memref<8x512xf32, #tpu.memory_space<vmem>>, vector<8x256xf32>
    %c8 = arith.constant 8 : index
    %c0_18 = arith.constant 0 : index
    %37 = vector.load %arg7[%c8, %c0_18] : memref<128x256xf32, #tpu.memory_space<vmem>>, vector<8x256xf32>
    tpu.vector_store %arg7[%c8, %c0_18], %36 {strides = array<i32>} : memref<128x256xf32, #tpu.memory_space<vmem>>, vector<8x256xf32>,
    %c0_19 = arith.constant 0 : index
    %c113 = arith.constant 113 : index
    %38 = vector.load %arg8[%c0_19, %c113] : memref<8x512xf32, #tpu.memory_space<vmem>>, vector<8x256xf32>
    %cst_20 = arith.constant 0.000000e+00 : f32
    %39 = vector.shape_cast %26 : vector<1x256xi1> to vector<1x256xi1>
    %40 = vector.broadcast %39 : vector<1x256xi1> to vector<8x256xi1>
    %41 = vector.broadcast %cst_20 : f32 to vector<8x256xf32>
    %42 = arith.select %40, %38, %41 : vector<8x256xi1>, vector<8x256xf32>
    %c16 = arith.constant 16 : index
    %c0_21 = arith.constant 0 : index
    %43 = vector.load %arg7[%c16, %c0_21] : memref<128x256xf32, #tpu.memory_space<vmem>>, vector<8x256xf32>
    tpu.vector_store %arg7[%c16, %c0_21], %42 {strides = array<i32>} : memref<128x256xf32, #tpu.memory_space<vmem>>, vector<8x256xf32>,
    %c0_22 = arith.constant 0 : index
    %c127 = arith.constant 127 : index
    %44 = vector.load %arg8[%c0_22, %c127] : memref<8x512xf32, #tpu.memory_space<vmem>>, vector<8x256xf32>
    %cst_23 = arith.constant 0.000000e+00 : f32
    %45 = vector.shape_cast %24 : vector<1x256xi1> to vector<1x256xi1>
    %46 = vector.broadcast %45 : vector<1x256xi1> to vector<8x256xi1>
    %47 = vector.broadcast %cst_23 : f32 to vector<8x256xf32>
    %48 = arith.select %46, %44, %47 : vector<8x256xi1>, vector<8x256xf32>
    %c24 = arith.constant 24 : index
    %c0_24 = arith.constant 0 : index
    %49 = vector.load %arg7[%c24, %c0_24] : memref<128x256xf32, #tpu.memory_space<vmem>>, vector<8x256xf32>
    tpu.vector_store %arg7[%c24, %c0_24], %48 {strides = array<i32>} : memref<128x256xf32, #tpu.memory_space<vmem>>, vector<8x256xf32>,
    %c32 = arith.constant 32 : index
    %c0_25 = arith.constant 0 : index
    %50 = vector.load %arg7[%c32, %c0_25] : memref<128x256xf32, #tpu.memory_space<vmem>>, vector<8x256xf32>
    tpu.vector_store %arg7[%c32, %c0_25], %28 {strides = array<i32>} : memref<128x256xf32, #tpu.memory_space<vmem>>, vector<8x256xf32>,
    %c0_26 = arith.constant 0 : index
    %c129 = arith.constant 129 : index
    %51 = vector.load %arg8[%c0_26, %c129] : memref<8x512xf32, #tpu.memory_space<vmem>>, vector<8x256xf32>
    %cst_27 = arith.constant 0.000000e+00 : f32
    %52 = vector.shape_cast %26 : vector<1x256xi1> to vector<1x256xi1>
    %53 = vector.broadcast %52 : vector<1x256xi1> to vector<8x256xi1>
    %54 = vector.broadcast %cst_27 : f32 to vector<8x256xf32>
    %55 = arith.select %53, %51, %54 : vector<8x256xi1>, vector<8x256xf32>
    %c40 = arith.constant 40 : index
    %c0_28 = arith.constant 0 : index
    %56 = vector.load %arg7[%c40, %c0_28] : memref<128x256xf32, #tpu.memory_space<vmem>>, vector<8x256xf32>
    tpu.vector_store %arg7[%c40, %c0_28], %55 {strides = array<i32>} : memref<128x256xf32, #tpu.memory_space<vmem>>, vector<8x256xf32>,
    %c0_29 = arith.constant 0 : index
    %c143 = arith.constant 143 : index
    %57 = vector.load %arg8[%c0_29, %c143] : memref<8x512xf32, #tpu.memory_space<vmem>>, vector<8x256xf32>
    %cst_30 = arith.constant 0.000000e+00 : f32
    %58 = vector.shape_cast %24 : vector<1x256xi1> to vector<1x256xi1>
    %59 = vector.broadcast %58 : vector<1x256xi1> to vector<8x256xi1>
    %60 = vector.broadcast %cst_30 : f32 to vector<8x256xf32>
    %61 = arith.select %59, %57, %60 : vector<8x256xi1>, vector<8x256xf32>
    %c48 = arith.constant 48 : index
    %c0_31 = arith.constant 0 : index
    %62 = vector.load %arg7[%c48, %c0_31] : memref<128x256xf32, #tpu.memory_space<vmem>>, vector<8x256xf32>
    tpu.vector_store %arg7[%c48, %c0_31], %61 {strides = array<i32>} : memref<128x256xf32, #tpu.memory_space<vmem>>, vector<8x256xf32>,
    %c0_32 = arith.constant 0 : index
    %c144 = arith.constant 144 : index
    %63 = vector.load %arg8[%c0_32, %c144] : memref<8x512xf32, #tpu.memory_space<vmem>>, vector<8x256xf32>
    %c56 = arith.constant 56 : index
    %c0_33 = arith.constant 0 : index
    %64 = vector.load %arg7[%c56, %c0_33] : memref<128x256xf32, #tpu.memory_space<vmem>>, vector<8x256xf32>
    tpu.vector_store %arg7[%c56, %c0_33], %63 {strides = array<i32>} : memref<128x256xf32, #tpu.memory_space<vmem>>, vector<8x256xf32>,
    %c0_34 = arith.constant 0 : index
    %c145 = arith.constant 145 : index
    %65 = vector.load %arg8[%c0_34, %c145] : memref<8x512xf32, #tpu.memory_space<vmem>>, vector<8x256xf32>
    %cst_35 = arith.constant 0.000000e+00 : f32
    %66 = vector.shape_cast %26 : vector<1x256xi1> to vector<1x256xi1>
    %67 = vector.broadcast %66 : vector<1x256xi1> to vector<8x256xi1>
    %68 = vector.broadcast %cst_35 : f32 to vector<8x256xf32>
    %69 = arith.select %67, %65, %68 : vector<8x256xi1>, vector<8x256xf32>
    %c64 = arith.constant 64 : index
    %c0_36 = arith.constant 0 : index
    %70 = vector.load %arg7[%c64, %c0_36] : memref<128x256xf32, #tpu.memory_space<vmem>>, vector<8x256xf32>
    tpu.vector_store %arg7[%c64, %c0_36], %69 {strides = array<i32>} : memref<128x256xf32, #tpu.memory_space<vmem>>, vector<8x256xf32>,
    %c0_37 = arith.constant 0 : index
    %c0_38 = arith.constant 0 : index
    %71 = vector.load %arg2[%c0_37, %c0_38] : memref<8x128xf32, #tpu.memory_space<vmem>>, vector<8x128xf32>
    %c0_39 = arith.constant 0 : index
    %c0_40 = arith.constant 0 : index
    %72 = vector.load %arg7[%c0_39, %c0_40] : memref<128x256xf32, #tpu.memory_space<vmem>>, vector<128x256xf32>
    %cst_41 = arith.constant dense<0.000000e+00> : vector<8x256xf32>
    %73 = tpu.matmul %71, %72, %cst_41 {dimension_numbers = #tpu.dot_dimension_numbers<[1], [0], [0], [1], [0, 0, 1, 1], [], []>} : vector<8x128xf32>, vector<128x256xf32>, vector<8x256xf32> -> vector<8x256xf32>
    %c0_42 = arith.constant 0 : index
    %c0_43 = arith.constant 0 : index
    %74 = vector.load %arg3[%c0_42, %c0_43] : memref<8x1xf32, #tpu.memory_space<vmem>>, vector<8x1xf32>
    %75 = vector.broadcast %74 : vector<8x1xf32> to vector<8x256xf32>
    %76 = arith.addf %73, %75 : vector<8x256xf32>
    %cst_44 = arith.constant 0.000000e+00 : f32
    %77 = vector.broadcast %cst_44 : f32 to vector<8x256xf32>
    %78 = arith.maximumf %76, %77 : vector<8x256xf32>
    %c0_45 = arith.constant 0 : index
    %c128_46 = arith.constant 128 : index
    %79 = vector.load %arg8[%c0_45, %c128_46] : memref<8x512xf32, #tpu.memory_space<vmem>>, vector<8x256xf32>
    tpu.vector_store %arg8[%c0_45, %c128_46], %78 {strides = array<i32>} : memref<8x512xf32, #tpu.memory_space<vmem>>, vector<8x256xf32>,
    %c0_47 = arith.constant 0 : index
    %c111_48 = arith.constant 111 : index
    %80 = vector.load %arg8[%c0_47, %c111_48] : memref<8x512xf32, #tpu.memory_space<vmem>>, vector<8x256xf32>
    %cst_49 = arith.constant 0.000000e+00 : f32
    %81 = vector.shape_cast %24 : vector<1x256xi1> to vector<1x256xi1>
    %82 = vector.broadcast %81 : vector<1x256xi1> to vector<8x256xi1>
    %83 = vector.broadcast %cst_49 : f32 to vector<8x256xf32>
    %84 = arith.select %82, %80, %83 : vector<8x256xi1>, vector<8x256xf32>
    %c0_50 = arith.constant 0 : index
    %c0_51 = arith.constant 0 : index
    %85 = vector.load %arg7[%c0_50, %c0_51] : memref<128x256xf32, #tpu.memory_space<vmem>>, vector<8x256xf32>
    tpu.vector_store %arg7[%c0_50, %c0_51], %84 {strides = array<i32>} : memref<128x256xf32, #tpu.memory_space<vmem>>, vector<8x256xf32>,
    %c0_52 = arith.constant 0 : index
    %c112_53 = arith.constant 112 : index
    %86 = vector.load %arg8[%c0_52, %c112_53] : memref<8x512xf32, #tpu.memory_space<vmem>>, vector<8x256xf32>
    %c8_54 = arith.constant 8 : index
    %c0_55 = arith.constant 0 : index
    %87 = vector.load %arg7[%c8_54, %c0_55] : memref<128x256xf32, #tpu.memory_space<vmem>>, vector<8x256xf32>
    tpu.vector_store %arg7[%c8_54, %c0_55], %86 {strides = array<i32>} : memref<128x256xf32, #tpu.memory_space<vmem>>, vector<8x256xf32>,
    %c0_56 = arith.constant 0 : index
    %c113_57 = arith.constant 113 : index
    %88 = vector.load %arg8[%c0_56, %c113_57] : memref<8x512xf32, #tpu.memory_space<vmem>>, vector<8x256xf32>
    %cst_58 = arith.constant 0.000000e+00 : f32
    %89 = vector.shape_cast %26 : vector<1x256xi1> to vector<1x256xi1>
    %90 = vector.broadcast %89 : vector<1x256xi1> to vector<8x256xi1>
    %91 = vector.broadcast %cst_58 : f32 to vector<8x256xf32>
    %92 = arith.select %90, %88, %91 : vector<8x256xi1>, vector<8x256xf32>
    %c16_59 = arith.constant 16 : index
    %c0_60 = arith.constant 0 : index
    %93 = vector.load %arg7[%c16_59, %c0_60] : memref<128x256xf32, #tpu.memory_space<vmem>>, vector<8x256xf32>
    tpu.vector_store %arg7[%c16_59, %c0_60], %92 {strides = array<i32>} : memref<128x256xf32, #tpu.memory_space<vmem>>, vector<8x256xf32>,
    %c0_61 = arith.constant 0 : index
    %c127_62 = arith.constant 127 : index
    %94 = vector.load %arg8[%c0_61, %c127_62] : memref<8x512xf32, #tpu.memory_space<vmem>>, vector<8x256xf32>
    %cst_63 = arith.constant 0.000000e+00 : f32
    %95 = vector.shape_cast %24 : vector<1x256xi1> to vector<1x256xi1>
    %96 = vector.broadcast %95 : vector<1x256xi1> to vector<8x256xi1>
    %97 = vector.broadcast %cst_63 : f32 to vector<8x256xf32>
    %98 = arith.select %96, %94, %97 : vector<8x256xi1>, vector<8x256xf32>
    %c24_64 = arith.constant 24 : index
    %c0_65 = arith.constant 0 : index
    %99 = vector.load %arg7[%c24_64, %c0_65] : memref<128x256xf32, #tpu.memory_space<vmem>>, vector<8x256xf32>
    tpu.vector_store %arg7[%c24_64, %c0_65], %98 {strides = array<i32>} : memref<128x256xf32, #tpu.memory_space<vmem>>, vector<8x256xf32>,
    %c32_66 = arith.constant 32 : index
    %c0_67 = arith.constant 0 : index
    %100 = vector.load %arg7[%c32_66, %c0_67] : memref<128x256xf32, #tpu.memory_space<vmem>>, vector<8x256xf32>
    tpu.vector_store %arg7[%c32_66, %c0_67], %78 {strides = array<i32>} : memref<128x256xf32, #tpu.memory_space<vmem>>, vector<8x256xf32>,
    %c0_68 = arith.constant 0 : index
    %c129_69 = arith.constant 129 : index
    %101 = vector.load %arg8[%c0_68, %c129_69] : memref<8x512xf32, #tpu.memory_space<vmem>>, vector<8x256xf32>
    %cst_70 = arith.constant 0.000000e+00 : f32
    %102 = vector.shape_cast %26 : vector<1x256xi1> to vector<1x256xi1>
    %103 = vector.broadcast %102 : vector<1x256xi1> to vector<8x256xi1>
    %104 = vector.broadcast %cst_70 : f32 to vector<8x256xf32>
    %105 = arith.select %103, %101, %104 : vector<8x256xi1>, vector<8x256xf32>
    %c40_71 = arith.constant 40 : index
    %c0_72 = arith.constant 0 : index
    %106 = vector.load %arg7[%c40_71, %c0_72] : memref<128x256xf32, #tpu.memory_space<vmem>>, vector<8x256xf32>
    tpu.vector_store %arg7[%c40_71, %c0_72], %105 {strides = array<i32>} : memref<128x256xf32, #tpu.memory_space<vmem>>, vector<8x256xf32>,
    %c0_73 = arith.constant 0 : index
    %c143_74 = arith.constant 143 : index
    %107 = vector.load %arg8[%c0_73, %c143_74] : memref<8x512xf32, #tpu.memory_space<vmem>>, vector<8x256xf32>
    %cst_75 = arith.constant 0.000000e+00 : f32
    %108 = vector.shape_cast %24 : vector<1x256xi1> to vector<1x256xi1>
    %109 = vector.broadcast %108 : vector<1x256xi1> to vector<8x256xi1>
    %110 = vector.broadcast %cst_75 : f32 to vector<8x256xf32>
    %111 = arith.select %109, %107, %110 : vector<8x256xi1>, vector<8x256xf32>
    %c48_76 = arith.constant 48 : index
    %c0_77 = arith.constant 0 : index
    %112 = vector.load %arg7[%c48_76, %c0_77] : memref<128x256xf32, #tpu.memory_space<vmem>>, vector<8x256xf32>
    tpu.vector_store %arg7[%c48_76, %c0_77], %111 {strides = array<i32>} : memref<128x256xf32, #tpu.memory_space<vmem>>, vector<8x256xf32>,
    %c0_78 = arith.constant 0 : index
    %c144_79 = arith.constant 144 : index
    %113 = vector.load %arg8[%c0_78, %c144_79] : memref<8x512xf32, #tpu.memory_space<vmem>>, vector<8x256xf32>
    %c56_80 = arith.constant 56 : index
    %c0_81 = arith.constant 0 : index
    %114 = vector.load %arg7[%c56_80, %c0_81] : memref<128x256xf32, #tpu.memory_space<vmem>>, vector<8x256xf32>
    tpu.vector_store %arg7[%c56_80, %c0_81], %113 {strides = array<i32>} : memref<128x256xf32, #tpu.memory_space<vmem>>, vector<8x256xf32>,
    %c0_82 = arith.constant 0 : index
    %c145_83 = arith.constant 145 : index
    %115 = vector.load %arg8[%c0_82, %c145_83] : memref<8x512xf32, #tpu.memory_space<vmem>>, vector<8x256xf32>
    %cst_84 = arith.constant 0.000000e+00 : f32
    %116 = vector.shape_cast %26 : vector<1x256xi1> to vector<1x256xi1>
    %117 = vector.broadcast %116 : vector<1x256xi1> to vector<8x256xi1>
    %118 = vector.broadcast %cst_84 : f32 to vector<8x256xf32>
    %119 = arith.select %117, %115, %118 : vector<8x256xi1>, vector<8x256xf32>
    %c64_85 = arith.constant 64 : index
    %c0_86 = arith.constant 0 : index
    %120 = vector.load %arg7[%c64_85, %c0_86] : memref<128x256xf32, #tpu.memory_space<vmem>>, vector<8x256xf32>
    tpu.vector_store %arg7[%c64_85, %c0_86], %119 {strides = array<i32>} : memref<128x256xf32, #tpu.memory_space<vmem>>, vector<8x256xf32>,
    %c0_87 = arith.constant 0 : index
    %c0_88 = arith.constant 0 : index
    %121 = vector.load %arg4[%c0_87, %c0_88] : memref<8x128xf32, #tpu.memory_space<vmem>>, vector<8x128xf32>
    %c0_89 = arith.constant 0 : index
    %c0_90 = arith.constant 0 : index
    %122 = vector.load %arg7[%c0_89, %c0_90] : memref<128x256xf32, #tpu.memory_space<vmem>>, vector<128x256xf32>
    %cst_91 = arith.constant dense<0.000000e+00> : vector<8x256xf32>
    %123 = tpu.matmul %121, %122, %cst_91 {dimension_numbers = #tpu.dot_dimension_numbers<[1], [0], [0], [1], [0, 0, 1, 1], [], []>} : vector<8x128xf32>, vector<128x256xf32>, vector<8x256xf32> -> vector<8x256xf32>
    %c0_92 = arith.constant 0 : index
    %c0_93 = arith.constant 0 : index
    %124 = vector.load %arg5[%c0_92, %c0_93] : memref<8x1xf32, #tpu.memory_space<vmem>>, vector<8x1xf32>
    %125 = vector.broadcast %124 : vector<8x1xf32> to vector<8x256xf32>
    %126 = arith.addf %123, %125 : vector<8x256xf32>
    %127 = arith.addf %126, %28 : vector<8x256xf32>
    %cst_94 = arith.constant 0.000000e+00 : f32
    %128 = vector.broadcast %cst_94 : f32 to vector<8x256xf32>
    %129 = arith.maximumf %127, %128 : vector<8x256xf32>
    %130 = vector.shape_cast %129 : vector<8x256xf32> to vector<1x8x256xf32>
    %c0_95 = arith.constant 0 : index
    %c0_96 = arith.constant 0 : index
    %c0_97 = arith.constant 0 : index
    %131 = vector.load %arg6[%c0_95, %c0_96, %c0_97] : memref<1x8x256xf32, #tpu.memory_space<vmem>>, vector<1x8x256xf32>
    tpu.vector_store %arg6[%c0_95, %c0_96, %c0_97], %130 {strides = array<i32>} : memref<1x8x256xf32, #tpu.memory_space<vmem>>, vector<1x8x256xf32>,
    return
  }
  func.func @transform_0(%arg0: i32) -> (i32, i32, i32) {
    %c0_i32 = arith.constant 0 : i32
    %c0_i32_0 = arith.constant 0 : i32
    %c0_i32_1 = arith.constant 0 : i32
    return %arg0, %c0_i32, %c0_i32_0 : i32, i32, i32
  }
  func.func @transform_1(%arg0: i32) -> (i32, i32) {
    %c0_i32 = arith.constant 0 : i32
    %c0_i32_0 = arith.constant 0 : i32
    %c0_i32_1 = arith.constant 0 : i32
    return %c0_i32, %c0_i32_0 : i32, i32
  }
  func.func @transform_2(%arg0: i32) -> (i32, i32) {
    %c0_i32 = arith.constant 0 : i32
    %c0_i32_0 = arith.constant 0 : i32
    %c0_i32_1 = arith.constant 0 : i32
    return %c0_i32, %c0_i32_0 : i32, i32
  }
  func.func @transform_3(%arg0: i32) -> (i32, i32) {
    %c0_i32 = arith.constant 0 : i32
    %c0_i32_0 = arith.constant 0 : i32
    %c0_i32_1 = arith.constant 0 : i32
    return %c0_i32, %c0_i32_0 : i32, i32
  }
  func.func @transform_4(%arg0: i32) -> (i32, i32) {
    %c0_i32 = arith.constant 0 : i32
    %c0_i32_0 = arith.constant 0 : i32
    %c0_i32_1 = arith.constant 0 : i32
    return %c0_i32, %c0_i32_0 : i32, i32
  }
  func.func @transform_5(%arg0: i32) -> (i32, i32, i32) {
    %c0_i32 = arith.constant 0 : i32
    %c0_i32_0 = arith.constant 0 : i32
    %c0_i32_1 = arith.constant 0 : i32
    return %arg0, %c0_i32, %c0_i32_0 : i32, i32, i32
  }
}

</mosaic_0001>

<bundles_post_ra>
// kernel: tpu_custom_call.1
= control target key start
LH: loop header
LB: loop body
LE: loop exit
PB: predicated region body
PF: predicated region fallthrough
CT: control target
= control target key end

     0   :  { %10 = vsyncpa [#allocation5], 0  ;;  %s1688_s0 = inlined_call_operand.hbm [shape: f32[2,8,256], index: 0, kind: input, shape index: {}]   ;;  %s1689_s1 = inlined_call_operand.vmem [shape: f32[8,128], index: 1, kind: input, shape index: {}]   ;;  %s1690_s2 = inlined_call_operand.vmem [shape: f32[8,1], index: 2, kind: input, shape index: {}]   ;;  %s1691_s3 = inlined_call_operand.vmem [shape: f32[8,128], index: 3, kind: input, shape index: {}]   ;;  %s1692_s4 = inlined_call_operand.vmem [shape: f32[8,1], index: 4, kind: input, shape index: {}]   ;;  %s1693_s5 = inlined_call_operand.hbm [shape: f32[2,8,256], index: 5, kind: output, shape index: {}]  }
   0x1   :  { %12 = vsyncpa [#allocation5 + $0x1], 0 }
   0x2   :  { %13 = vsyncpa [#allocation6], 0 }
   0x3   :  { %15 = vsyncpa [#allocation6 + $0x1], 0  ;;  %s1297_s18 = smov 0   ;;  %s1299_s19 = smov 0  }
   0x4   :  { %s1301_s20 = smov 0   ;;  %s1303_s21 = smov 0  }
   0x5 LB: > { %s1318_s22 = sadd.s32 4294967295, %s1252_s21   ;;  %s939_s23 = sadd.s32 4294967294, %s1252_s21   ;;  %s1252_s21 = sphi %s1303_s21, %s1729_s21   ;;  %s1248_s20 = sphi %s1301_s20, %s1728_s20   ;;  %s1244_s19 = sphi %s1299_s19, %s1727_s19   ;;  %s1240_s18 = sphi %s1297_s18, %s1726_s18  }
   0x6   : > { %s1322_s24 = sadd.s32 1, %s1252_s21   ;;  %s28_s25 = sadd.s32 1, %s1248_s20 }
   0x7   : > { %s25_s26 = ssub.s32 %s1252_s21, %s1322_s24  ;;  %p35_p0 = scmp.ne.s32.totalorder %s1248_s20, %s1244_s19 }
   0x8   : > { %p26_p1 = scmp.eq.s32.totalorder %s25_s26, 0  ;;  %p36_p2 = scmp.eq.s32.totalorder %s1252_s21, 0 }
   0x9   : > { %p41_p3 = scmp.ne.s32.totalorder %s1244_s19, %s1240_s18  ;;  %p42_p4 = scmp.eq.s32.totalorder %s1318_s22, 0 }
   0xa   : > { %s1334_s27 = scalar_select %p26_p1, %s1248_s20, %s28_s25  }
   0xb   : > { %p1336_p5 = por %p36_p2, %p35_p0  ;;  %p1340_p6 = por %p42_p4, %p41_p3 }
   0xc   : > { %p149_p7 = scmp.eq.s32.totalorder %s1318_s22, 1  ;;  %p155_p8 = scmp.eq.s32.totalorder %s939_s23, 1 }
   0xd   : > { %p1039_p10 = scmp.lt.s32.totalorder %s1252_s21, 2  ;;  %s187_s7 = sand.u32 1, %s1248_s20  }
   0xe   : > { %p1347_p11 = por %p149_p7, %p35_p0  ;;  %p1351_p12 = por %p155_p8, %p41_p3 }
   0xf   : > { %s953_s8 = sshll.u32 %s1252_s21, 8  ;;  %s942_s9 = sshll.u32 %s187_s7, 4 }
  0x10   : > { %s1699_s30 = scalar_select %p1347_p11, 1, 0 }
  0x11   : > { %s1700_s6 = scalar_select %p1351_p12, 1, 0 }
  0x12   : > { %s1360_s12 = scalar_lea.hbm %s1688_s0, %s953_s8  ;;  %s191_s13 = scalar_lea.vmem [#allocation4], %s942_s9 }
  0x13   : > { %s199_s14 = sshll.u32 %s191_s13, 4  ;;  %p1364_p13 = pnand %p1039_p10, %p1336_p5  ;;  %s1368_s14 = int_to_ptr.vmem [resolvable:$true] %s199_s14 }
  0x14   : > { %s188_s16 = scalar_lea.sflag [#allocation5], %s187_s7  ;;  %s1156_s17 = scalar_lea.hbm %s1360_s12, 256 }
  0x15   : > { %p1157_p2 = scmp.ne.s32.totalorder %s1360_s12, %s1156_s17  ;;  %p1158_p3 = pneg %p1364_p13 }
  0x16   : > { %s1161_s26 = scalar_lea.hbm %s1688_s0, 512  ;;  %p1162_p5 = scmp.lt.u32.totalorder %s1360_s12, %s1688_s0 }
  0x17   : > { %p1159_p4 = pnand %p1158_p3, %p1157_p2  ;;  %p1163_p8 = scmp.lt.u32.totalorder %s1161_s26, %s1156_s17 }
  0x18   : > { %p1165_p9 = scmp.lt.u32.totalorder %s1156_s17, %s1360_s12 }
  0x19   : > { %p1160_p7 = pneg %p1159_p4  ;;  %p1164_p10 = por %p1163_p8, %p1162_p5 }
  0x1b   : > { %p1166_p0 = por %p1165_p9, %p1164_p10 }
  0x1d   : > { %p1167_p1 = pnand %p1166_p0, %p1160_p7 }
  0x1f   : > { %1170 = shalt.err (!%p1167_p1)
}
  0x20   : > { %s1171_s7 = scalar_lea.vmem %s1368_s14, 256  ;;  %s1254_s9 = smov [#allocation4]  }
  0x21   : > { %p1172_p2 = scmp.ne.s32.totalorder %s1368_s14, %s1171_s7  ;;  %s1176_s10 = sshll.u32 %s1254_s9, 4  ;;  %s1177_s10 = int_to_ptr.vmem [resolvable:$false] %s1176_s10 }
  0x22   : > { %s1178_s11 = scalar_lea.vmem %s1177_s10, 512  ;;  %p1179_p11 = scmp.lt.s32.totalorder %s1368_s14, %s1177_s10 }
  0x23   : > { %p1174_p4 = pnand %p1172_p2, %p1158_p3  ;;  %p1180_p5 = scmp.lt.s32.totalorder %s1178_s11, %s1171_s7 }
  0x25   : > { %p1175_p12 = pneg %p1174_p4  ;;  %p1181_p8 = por %p1180_p5, %p1179_p11 }
  0x27   : > { %p1182_p9 = pnand %p1181_p8, %p1175_p12 }
  0x29   : > { %1185 = shalt.err (!%p1182_p9)
}
  0x2a   : > { %1034 = dma.hbm_to_vmem [thread:$0]  (!%p1364_p13), %s1360_s12, 256, %s1368_s14, %s188_s16  }
  0x2b   : > { %p1702_p0 = scmp.lt.s32.totalorder %s1252_s21, 3  ;;  %p1703_p1 = scmp.ge.s32.totalorder %s1252_s21, 1 }
  0x2d   : > { %p205_p3 = pnand %p1703_p1, %p1702_p0 }
  0x2e   : > { %s1402_s13 = sand.u32 (!%p205_p3), 1, %s1244_s19  }
  0x2f   : > { %208 = sbr.rel (%p205_p3) target bundleno = 801 (0x321), region = 40  ;;  %s946_s17 = sshll.u32 (!%p205_p3), %s1402_s13, 4 }
  0x30   : > { %s211_s23 = scalar_lea.sflag (!%p205_p3), [#allocation5], %s1402_s13  ;;  %s214_s15 = scalar_lea.vmem (!%p205_p3), [#allocation4], %s946_s17 }
  0x36   : > { %1231 = dma.done.wait (%p1340_p6), %s211_s23, 256  }
  0x37   : > { %1233 = vsyncadd (%p1340_p6), %s211_s23, 4294967040  ;;  %v1255_v0 = vmov 0.0   ;;  %s1256_s12 = smov 17   ;;  %s1257_s14 = smov 16   ;;  %v1418_v1 = vld [vmem:[%s214_s15] sm:$0xff]  ;;  %v1420_v2 = vld [vmem:[%s214_s15 + $0x8] sm:$0xff]  ;;  %v257_v7 = vlaneseq }
  0x38   : > { %302 = vrot.lane.b32.xlu1 %v1255_v0, %s1256_s12  ;;  %569 = vmatprep.mubr.f32.mxu0 %v1255_v0  ;;  %v1084_v3 = vpack.i.bf16 %v1420_v2, %v1418_v1  ;;  %s1258_s29 = smov 1   ;;  %s1259_s16 = smov 15   ;;  %v1114_v4 = vpack.i.bf16 %v1255_v0, %v1420_v2  ;;  %v499_v5 = vld [vmem:[%s1690_s2] sm:$0xff]  ;;  %v1264_v6 = vmov 0   ;;  %vm308_vm0 = vcmask 138240  }
  0x39   : > { %841 = vmatprep.mubr.f32.mxu1 %v1255_v0  ;;  %s1260_s25 = smov 127   ;;  %s1261_s26 = smov 112   ;;  %1119 = vset.pattern.permute.xlu1 %v1264_v6  ;;  %v258_v9 = vand.u32 127, %v257_v7  ;;  %vm329_vm2 = vcmask 130048   ;;  %vm373_vm4 = vcmask 7168   ;;  %vm1265_vm5 = vmmov 1  }
  0x3a   : > { %1085 = vrot.lane.b32.xlu0 %v1084_v3, %s1256_s12  ;;  %s1262_s28 = smov 113   ;;  %s1263_s8 = smov 111   ;;  %vm352_vm8 = vcmask 121856   ;;  %vm1696_vm13 = vcmask 1039360   ;;  %vm438_vm14 = vcmask 916480  }
  0x3b   : > { %1155 = vset.pattern.permute.xlu0 %v1264_v6  ;;  %v259_v11 = vadd.s32 128, %v258_v9  ;;  %v264_v15 = vand.u32 15, %v258_v9  ;;  %p1723_p11 = scmp.ne.s32.totalorder %s1699_s30, 0 }
  0x3c   : > { %323 = vrot.lane.b32.xlu1 %v1255_v0, %s1257_s14 }
  0x3d   : > { %v271_v14 = vand.u32 15, %v259_v11  ;;  %vm1464_vm3 = vcmp.ge.s32.totalorder %v264_v15, 1  ;;  %vm1493_vm10 = vcmp.le.s32.totalorder %v264_v15, 14 }
  0x3e   : > { %1090 = vrot.lane.b32.xlu0 %v1084_v3, %s1257_s14  ;;  %vm1482_vm7 = vmpackc.low %vm1265_vm5, %vm1464_vm3 }
  0x3f   : > { %vm1460_vm1 = vcmp.ge.s32.totalorder %v271_v14, 1  ;;  %vm1486_vm9 = vcmp.le.s32.totalorder %v271_v14, 14  ;;  %vm1695_vm12 = vmpackc.low %vm1464_vm3, %vm1493_vm10 }
  0x40   : > { %1100 = vrot.lane.b32.xlu1 %v1084_v3, %s1258_s29  ;;  %vm1473_vm6 = vmpackc.low %vm1265_vm5, %vm1460_vm1 }
  0x41   : > { %vm986_vm11 = vmpackc.low %vm1460_vm1, %vm1486_vm9 }
  0x42   : > { %1095 = vrot.lane.b32.xlu0 %v1084_v3, %s1259_s16  ;;  %vm1525_vm15 = vmpackc.low %vm1486_vm9, %vm1265_vm5 }
  0x44   : > { %367 = vrot.lane.b32.xlu1 %v1255_v0, %s1258_s29 }
  0x46   : > { %346 = vrot.lane.b32.xlu0 %v1255_v0, %s1259_s16 }
  0x48   : > { %390 = vrot.lane.b32.xlu1 %v1418_v1, %s1260_s25 }
  0x4a   : > { %1105 = vrot.lane.b32.xlu0 %v1114_v4, %s1260_s25 }
  0x4c   : > { %1115 = vrot.lane.b32.xlu1 %v1114_v4, %s1261_s26 }
  0x4e   : > { %1110 = vrot.lane.b32.xlu0 %v1114_v4, %s1262_s28 }
  0x50   : > { %432 = vrot.lane.b32.xlu1 %v1418_v1, %s1261_s26 }
  0x52   : > { %411 = vrot.lane.b32.xlu0 %v1418_v1, %s1262_s28 }
  0x54   : > { %455 = vrot.lane.b32.xlu1 %v1255_v0, %s1263_s8 }
  0x56   : > { %453 = vrot.lane.b32.xlu0 %v1420_v2, %s1263_s8 }
  0x58   : > { %502 = vperm.xlu1 %1119, %v499_v5  }
  0x5a   : > { %451 = vrot.lane.b32.xlu0 %v1418_v1, %s1263_s8 }
  0x5c   : > { %606 = vrot.lane.b32.xlu1 %v1255_v0, %s1257_s14 }
  0x5e   : > { %586 = vrot.lane.b32.xlu0 %v1255_v0, %s1256_s12 }
  0x60   : > { %644 = vrot.lane.b32.xlu1 %v1255_v0, %s1258_s29 }
  0x62   : > { %624 = vrot.lane.b32.xlu0 %v1255_v0, %s1259_s16 }
  0xaa   : > { %v303_v8 = vpop.permute.xlu1 %302 }
  0xac   : > { %v1086_v12 = vpop.permute.xlu0 %1085 }
  0xad   : > { %v1088_v16 = vunpack.i.h.bf16 %v1086_v12  ;;  %v1087_v17 = vunpack.i.l.bf16 %v1086_v12 }
  0xae   : > { %v324_v10 = vpop.permute.xlu1 %323 }
  0xaf   : > { %v310_v26 = vsel %vm308_vm0, %v1087_v17, %v1088_v16  ;;  %v309_v29 = vsel %vm308_vm0, %v303_v8, %v1087_v17 }
  0xb0   : > { %v1091_v18 = vpop.permute.xlu0 %1090 }
  0xb1   : > { %v1093_v22 = vunpack.i.h.bf16 %v1091_v18  ;;  %v1092_v23 = vunpack.i.l.bf16 %v1091_v18 }
  0xb2   : > { %v1101_v13 = vpop.permute.xlu1 %1100 }
  0xb3   : > { %v1103_v24 = vunpack.i.h.bf16 %v1101_v13  ;;  %v1102_v25 = vunpack.i.l.bf16 %v1101_v13  ;;  %v331_v27 = vsel %vm329_vm2, %v1092_v23, %v1093_v22  ;;  %v330_v30 = vsel %vm329_vm2, %v324_v10, %v1092_v23  ;;  %v466_v13 = vld [vmem:[%s1689_s1] sm:$0xff] }
  0xb4   : > { %v1096_v31 = vpop.permute.xlu0 %1095  ;;  %v979_v32 = vpack.c.bf16 %v331_v27, %v310_v26  ;;  %v982_v33 = vpack.c.bf16 %v330_v30, %v309_v29  ;;  %v771_v26 = vld [vmem:[%s1692_s4] sm:$0xff] }
  0xb5   : > { %v1098_v37 = vunpack.i.h.bf16 %v1096_v31  ;;  %v1097_v38 = vunpack.i.l.bf16 %v1096_v31  ;;  %v375_v39 = vsel %vm373_vm4, %v1102_v25, %v1103_v24 }
  0xb6   : > { %v368_v21 = vpop.permute.xlu1 %367  ;;  %981 = vmatprep.subr.msk.bf16.mxu0 %vm1473_vm6, %v979_v32 }
  0xb7   : > { %984 = vmatpush1.bf16.msk.msra.mxu0 %vm1482_vm7, %v982_v33  ;;  %v374_v41 = vsel %vm373_vm4, %v368_v21, %v1102_v25  ;;  %v354_v42 = vsel %vm352_vm8, %v1097_v38, %v1098_v37 }
  0xb8   : > { %v347_v43 = vpop.permute.xlu0 %346  ;;  %v985_v44 = vpack.c.bf16 %v375_v39, %v354_v42 }
  0xb9   : > { %v353_v45 = vsel %vm352_vm8, %v347_v43, %v1097_v38 }
  0xba   : > { %v391_v36 = vpop.permute.xlu1 %390  ;;  %v988_v46 = vpack.c.bf16 %v374_v41, %v353_v45  ;;  %987 = vmatprep.subr.msk.bf16.mxu0 %vm986_vm11, %v985_v44 }
  0xbc   : > { %v1106_v48 = vpop.permute.xlu0 %1105  ;;  %990 = vmatpush1.bf16.msk.msra.mxu0 %vm1695_vm12, %v988_v46  ;;  %vm1534_vm12 = vmpackc.low %vm1493_vm10, %vm1265_vm5  ;;  %vm457_vm5 = vcmask 908288  }
  0xbd   : > { %v1108_v49 = vunpack.i.h.bf16 %v1106_v48  ;;  %v1107_v50 = vunpack.i.l.bf16 %v1106_v48 }
  0xbe   : > { %v1116_v47 = vpop.permute.xlu1 %1115 }
  0xbf   : > { %v1118_v51 = vunpack.i.h.bf16 %v1116_v47  ;;  %v1117_v52 = vunpack.i.l.bf16 %v1116_v47  ;;  %v397_v53 = vsel %vm1696_vm13, %v391_v36, %v1107_v50  ;;  %v398_v54 = vsel %vm1696_vm13, %v1107_v50, %v1108_v49 }
  0xc0   : > { %v991_v56 = vpack.c.bf16 %v398_v54, %v1420_v2  ;;  %v994_v57 = vpack.c.bf16 %v397_v53, %v1418_v1  ;;  %v1111_v58 = vpop.permute.xlu0 %1110  ;;  %vm417_vm13 = vcmask 924672  }
  0xc1   : > { %v1113_v61 = vunpack.i.h.bf16 %v1111_v58  ;;  %v1112_v62 = vunpack.i.l.bf16 %v1111_v58  ;;  %v440_v63 = vsel %vm438_vm14, %v1117_v52, %v1118_v51 }
  0xc2   : > { %v433_v60 = vpop.permute.xlu1 %432  ;;  %993 = vmatprep.subr.msk.bf16.mxu0 %vm1525_vm15, %v991_v56 }
  0xc3   : > { %996 = vmatpush1.bf16.msk.msra.mxu0 %vm1534_vm12, %v994_v57  ;;  %v439_v3 = vsel %vm438_vm14, %v433_v60, %v1117_v52  ;;  %v419_v4 = vsel %vm417_vm13, %v1112_v62, %v1113_v61 }
  0xc4   : > { %v412_v5 = vpop.permute.xlu0 %411  ;;  %v997_v6 = vpack.c.bf16 %v440_v63, %v419_v4 }
  0xc5   : > { %v418_v7 = vsel %vm417_vm13, %v412_v5, %v1112_v62 }
  0xc6   : > { %v1000_v8 = vpack.c.bf16 %v439_v3, %v418_v7  ;;  %999 = vmatprep.subr.msk.bf16.mxu0 %vm1473_vm6, %v997_v6  ;;  %v456_v9 = vpop.permute.xlu1 %455 }
  0xc8   : > { %v454_v10 = vpop.permute.xlu0 %453  ;;  %1002 = vmatpush1.bf16.msk.msra.mxu0 %vm1482_vm7, %v1000_v8 }
  0xc9   : > { %v459_v11 = vsel %vm457_vm5, %v454_v10, %v456_v9 }
  0xca   : > { %965 = vmatprep.subr.msk.mxu0 %vm1486_vm9, %v459_v11 }
  0xcc   : > { %v452_v12 = vpop.permute.xlu0 %451 }
  0xcd   : > { %v458_v14 = vsel %vm457_vm5, %v452_v12, %v454_v10 }
  0xce   : > { %966 = vmatpush1.msk.msra.mxu0 %vm1493_vm10, %v458_v14 }
  0xcf   : > { %570 = vmatmul.mubr.f32.vlgmr.msra.gmra.mrb[0].mxu0 %v466_v13 }
  0xd0   : > { %v587_v29 = vpop.permute.xlu0 %586 }
  0xd4   : > { %v625_v31 = vpop.permute.xlu0 %624 }
  0xd7   : > { %v503_v15 = vpop.permute.xlu1 %502 }
  0xdb   : > { %v607_v27 = vpop.permute.xlu1 %606 }
  0xdf   : > { %v645_v30 = vpop.permute.xlu1 %644 }
 0x1a2   : > { %v571_v16 = vpop.f32.mrb[0].mxu0 }
 0x1a3   : > { %v572_v17 = vadd.f32 %v571_v16, %v503_v15  ;;  %v573_v18 = vpop.f32.mrb[1].mxu0 }
 0x1a4   : > { %v574_v21 = vadd.f32 %v573_v18, %v503_v15 }
 0x1a5   : > { %v1559_v22 = vmax.f32 %v572_v17, 0.0 }
 0x1a6   : > { %v1561_v23 = vmax.f32 %v574_v21, 0.0 }
 0x1a8   : > { %v1125_v24 = vpack.i.bf16 %v1561_v23, %v1559_v22  ;;  %v1150_v25 = vpack.i.bf16 %v1255_v0, %v1561_v23 }
 0x1aa   : > { %1126 = vrot.lane.b32.xlu1 %v1125_v24, %s1257_s14  ;;  %1121 = vrot.lane.b32.xlu0 %v1125_v24, %s1256_s12 }
 0x1ae   : > { %1136 = vrot.lane.b32.xlu1 %v1125_v24, %s1258_s29  ;;  %1131 = vrot.lane.b32.xlu0 %v1125_v24, %s1259_s16  ;;  %v738_v24 = vld [vmem:[%s1691_s3] sm:$0xff]  ;;  %s954_s29 = sshll.u32 %s1318_s22, 8  ;;  %s240_s16 = scalar_lea.vmem [#allocation7], %s946_s17 }
 0x1af   : > { %s855_s22 = scalar_lea.sflag [#allocation6], %s1402_s13  ;;  %s1266_s17 = smov [#allocation7]  }
 0x1b0   : > { %s1190_s9 = sshll.u32 %s1266_s17, 4  ;;  %s1191_s9 = int_to_ptr.vmem [resolvable:$false] %s1190_s9 }
 0x1b1   : > { %s1192_s10 = scalar_lea.vmem %s1191_s9, 512 }
 0x1b2   : > { %666 = vrot.lane.b32.xlu1 %v1559_v22, %s1260_s25  ;;  %686 = vrot.lane.b32.xlu0 %v1559_v22, %s1262_s28 }
 0x1b6   : > { %1151 = vrot.lane.b32.xlu1 %v1150_v25, %s1261_s26  ;;  %1141 = vrot.lane.b32.xlu0 %v1150_v25, %s1260_s25  ;;  %s869_s25 = sshll.u32 %s240_s16, 4  ;;  %s1646_s25 = int_to_ptr.vmem [resolvable:$true] %s869_s25 }
 0x1b7   : > { %s1186_s7 = scalar_lea.vmem %s1646_s25, 256  ;;  %p1193_p7 = scmp.lt.s32.totalorder %s1646_s25, %s1191_s9 }
 0x1b8   : > { %p1187_p6 = scmp.ne.s32.totalorder %s1646_s25, %s1186_s7  ;;  %p1194_p10 = scmp.lt.s32.totalorder %s1192_s10, %s1186_s7 }
 0x1ba   : > { %706 = vrot.lane.b32.xlu1 %v1559_v22, %s1261_s26  ;;  %1146 = vrot.lane.b32.xlu0 %v1150_v25, %s1262_s28  ;;  %p1188_p12 = pnand %p1187_p6, %p1723_p11  ;;  %p1195_p2 = por %p1194_p10, %p1193_p7 }
 0x1bc   : > { %p1189_p13 = pneg %p1188_p12 }
 0x1be   : > { %728 = vrot.lane.b32.xlu1 %v1255_v0, %s1263_s8  ;;  %726 = vrot.lane.b32.xlu0 %v1561_v23, %s1263_s8  ;;  %p1196_p4 = pnand %p1195_p2, %p1189_p13 }
 0x1c2   : > { %774 = vperm.xlu1 %1119, %v771_v26   ;;  %724 = vrot.lane.b32.xlu0 %v1559_v22, %s1263_s8  ;;  %s1644_s8 = scalar_lea.hbm %s1693_s5, %s954_s29 }
 0x21c   : > { %v1127_v32 = vpop.permute.xlu1 %1126  ;;  %v1122_v33 = vpop.permute.xlu0 %1121 }
 0x21d   : > { %v1129_v36 = vunpack.i.h.bf16 %v1127_v32  ;;  %v1128_v37 = vunpack.i.l.bf16 %v1127_v32  ;;  %v1124_v0 = vunpack.i.h.bf16 %v1122_v33  ;;  %v1123_v38 = vunpack.i.l.bf16 %v1122_v33 }
 0x21f   : > { %v593_v39 = vsel %vm308_vm0, %v1123_v38, %v1124_v0  ;;  %v613_v41 = vsel %vm329_vm2, %v1128_v37, %v1129_v36  ;;  %v592_v42 = vsel %vm308_vm0, %v587_v29, %v1123_v38  ;;  %v612_v43 = vsel %vm329_vm2, %v607_v27, %v1128_v37  ;;  %vm1720_vm0 = vmpackc.low %vm1464_vm3, %vm1493_vm10 }
 0x220   : > { %v1137_v44 = vpop.permute.xlu1 %1136  ;;  %v1132_v45 = vpop.permute.xlu0 %1131  ;;  %v1003_v46 = vpack.c.bf16 %v613_v41, %v593_v39  ;;  %v1006_v47 = vpack.c.bf16 %v612_v43, %v592_v42  ;;  %vm1721_vm2 = vcmask 1039360  }
 0x221   : > { %v1139_v48 = vunpack.i.h.bf16 %v1137_v44  ;;  %v1138_v49 = vunpack.i.l.bf16 %v1137_v44  ;;  %v1134_v50 = vunpack.i.h.bf16 %v1132_v45  ;;  %v1133_v51 = vunpack.i.l.bf16 %v1132_v45 }
 0x222   : > { %1005 = vmatprep.subr.msk.bf16.mxu1 %vm1473_vm6, %v1003_v46 }
 0x223   : > { %v650_v52 = vsel %vm373_vm4, %v645_v30, %v1138_v49  ;;  %v651_v53 = vsel %vm373_vm4, %v1138_v49, %v1139_v48  ;;  %v630_v54 = vsel %vm352_vm8, %v625_v31, %v1133_v51  ;;  %v631_v56 = vsel %vm352_vm8, %v1133_v51, %v1134_v50  ;;  %1008 = vmatpush1.bf16.msk.msra.mxu1 %vm1482_vm7, %v1006_v47  ;;  %vm1722_vm4 = vmmov %vm1721_vm2 }
 0x224   : > { %v1009_v57 = vpack.c.bf16 %v651_v53, %v631_v56  ;;  %v1012_v58 = vpack.c.bf16 %v650_v52, %v630_v54  ;;  %v667_v60 = vpop.permute.xlu1 %666  ;;  %v687_v61 = vpop.permute.xlu0 %686 }
 0x226   : > { %1011 = vmatprep.subr.msk.bf16.mxu1 %vm986_vm11, %v1009_v57 }
 0x227   : > { %1014 = vmatpush1.bf16.msk.msra.mxu1 %vm1720_vm0, %v1012_v58 }
 0x228   : > { %v1152_v62 = vpop.permute.xlu1 %1151  ;;  %v1142_v63 = vpop.permute.xlu0 %1141 }
 0x229   : > { %v1144_v3 = vunpack.i.h.bf16 %v1142_v63  ;;  %v1143_v4 = vunpack.i.l.bf16 %v1142_v63  ;;  %v1154_v5 = vunpack.i.h.bf16 %v1152_v62  ;;  %v1153_v6 = vunpack.i.l.bf16 %v1152_v62 }
 0x22b   : > { %v672_v7 = vsel %vm1721_vm2, %v667_v60, %v1143_v4  ;;  %v673_v19 = vsel %vm1722_vm4, %v1143_v4, %v1144_v3  ;;  %v713_v13 = vsel %vm438_vm14, %v1153_v6, %v1154_v5 }
 0x22c   : > { %v1015_v8 = vpack.c.bf16 %v673_v19, %v1561_v23  ;;  %v1018_v9 = vpack.c.bf16 %v672_v7, %v1559_v22  ;;  %v707_v10 = vpop.permute.xlu1 %706  ;;  %v1147_v20 = vpop.permute.xlu0 %1146 }
 0x22d   : > { %v1149_v11 = vunpack.i.h.bf16 %v1147_v20  ;;  %v1148_v12 = vunpack.i.l.bf16 %v1147_v20  ;;  %v712_v14 = vsel %vm438_vm14, %v707_v10, %v1153_v6 }
 0x22e   : > { %1017 = vmatprep.subr.msk.bf16.mxu1 %vm1525_vm15, %v1015_v8 }
 0x22f   : > { %v692_v15 = vsel %vm417_vm13, %v687_v61, %v1148_v12  ;;  %v693_v16 = vsel %vm417_vm13, %v1148_v12, %v1149_v11  ;;  %1020 = vmatpush1.bf16.msk.msra.mxu1 %vm1534_vm12, %v1018_v9 }
 0x230   : > { %v1021_v17 = vpack.c.bf16 %v713_v13, %v693_v16  ;;  %v1024_v18 = vpack.c.bf16 %v712_v14, %v692_v15  ;;  %v729_v21 = vpop.permute.xlu1 %728  ;;  %v727_v22 = vpop.permute.xlu0 %726 }
 0x231   : > { %v731_v55 = vsel %vm457_vm5, %v727_v22, %v729_v21 }
 0x232   : > { %1023 = vmatprep.subr.msk.bf16.mxu1 %vm1473_vm6, %v1021_v17 }
 0x233   : > { %1026 = vmatpush1.bf16.msk.msra.mxu1 %vm1482_vm7, %v1024_v18 }
 0x234   : > { %v725_v23 = vpop.permute.xlu0 %724  ;;  %977 = vmatprep.subr.msk.mxu1 %vm1486_vm9, %v731_v55 }
 0x235   : > { %v730_v59 = vsel %vm457_vm5, %v725_v23, %v727_v22 }
 0x237   : > { %978 = vmatpush1.msk.msra.mxu1 %vm1493_vm10, %v730_v59 }
 0x238   : > { %842 = vmatmul.mubr.f32.vlgmr.msra.gmra.mrb[0].mxu1 %v738_v24 }
 0x241   : > { %v775_v28 = vpop.permute.xlu1 %774 }
 0x30b   : > { %v843_v25 = vpop.f32.mrb[0].mxu1 }
 0x30c   : > { %v844_v26 = vadd.f32 %v843_v25, %v775_v28  ;;  %v845_v34 = vpop.f32.mrb[1].mxu1 }
 0x30d   : > { %v846_v27 = vadd.f32 %v845_v34, %v775_v28 }
 0x30e   : > { %v848_v35 = vadd.f32 %v844_v26, %v1418_v1 }
 0x30f   : > { %v849_v29 = vadd.f32 %v846_v27, %v1420_v2 }
 0x310   : > { %v850_v30 = vmax.f32 %v848_v35, 0.0 }
 0x311   : > { %v851_v31 = vmax.f32 %v849_v29, 0.0 }
 0x312   : > { %852 = vst [vmem:[%s240_s16] sm:$0xff] %v850_v30 }
 0x313   : > { %853 = vst [vmem:[%s240_s16 + $0x8] sm:$0xff] %v851_v31 }
 0x314   : > { %1199 = shalt.err (!%p1196_p4)
}
 0x315   : > { %s1200_s13 = scalar_lea.hbm %s1644_s8, 256  ;;  %s1204_s15 = scalar_lea.hbm %s1693_s5, 512 }
 0x316   : > { %p1201_p5 = scmp.ne.s32.totalorder %s1644_s8, %s1200_s13  ;;  %p1205_p0 = scmp.lt.u32.totalorder %s1644_s8, %s1693_s5 }
 0x317   : > { %p1206_p1 = scmp.lt.u32.totalorder %s1204_s15, %s1200_s13  ;;  %p1208_p6 = scmp.lt.u32.totalorder %s1200_s13, %s1644_s8 }
 0x318   : > { %p1202_p8 = pnand %p1201_p5, %p1723_p11 }
 0x319   : > { %p1207_p3 = por %p1206_p1, %p1205_p0 }
 0x31a   : > { %p1203_p9 = pneg %p1202_p8 }
 0x31b   : > { %p1209_p12 = por %p1208_p6, %p1207_p3 }
 0x31d   : > { %p1210_p13 = pnand %p1209_p12, %p1203_p9 }
 0x31f   : > { %1213 = shalt.err (!%p1210_p13)
}
 0x320   : > { %1029 = dma.vmem_to_hbm [thread:$0]  (%p1723_p11), %s1646_s25, 256, %s1644_s8, %s855_s22  }
 0x321 PF: > { %s881_s29 = sand.u32 1, %s1240_s18   ;;  %p1724_p7 = scmp.ne.s32.totalorder %s1700_s6, 0 }
 0x322   : > { %p1725_p10 = scmp.ge.s32.totalorder %s1252_s21, 2  ;;  %s882_s16 = scalar_lea.sflag [#allocation6], %s881_s29 }
 0x324   : > { %p1036_p2 = pnand %p1725_p10, %p1724_p7 }
 0x326   : > { %1235 = dma.done.wait (!%p1036_p2), %s882_s16, 256  }
 0x327   : > { %1237 = vsyncadd (!%p1036_p2), %s882_s16, 4294967040  ;;  %p18_p4 = scmp.ge.s32.totalorder %s1322_s24, 4   ;;  %s1726_s18 = smov %s1244_s19 }
 0x328   : > { %s1727_s19 = smov %s1248_s20  ;;  %s1728_s20 = smov %s1334_s27 }
 0x329   : > { %s1729_s21 = smov %s1322_s24  ;;  %20 = sbr.rel (!%p18_p4) target bundleno = 5 (0x5), region = 85 }
 0x330   :  { %887 = vsyncpa [#allocation5], 1 }
 0x331   :  { %889 = vsyncpa [#allocation5 + $0x1], 1 }
 0x332   :  { %890 = vsyncpa [#allocation6], 1 }
 0x333   :  { %892 = vsyncpa [#allocation6 + $0x1], 1 }

</bundles_post_ra>
